<compile_context>
chip_gen: v5e
topology: v5e:2x2
jax: 0.10.0
libtpu: 0.0.40
codegen_flags: <defaults>
</compile_context>

<pallas_src>
import math
import numpy as np

import jax
import jax.numpy as jnp
from jax.experimental import pallas as pl
from jax.experimental.pallas import tpu as pltpu

# ---------------------------------------------------------------------------
# Problem sizes (small, consistent with the module's forward)
# ---------------------------------------------------------------------------
B = 2           # batch
CIN = 8         # in_channels
COUT = 3        # out_channels (to-RGB)
S = 16          # num_style_feat
H = W = 16      # spatial
HW = H * W


# ---------------------------------------------------------------------------
# Pallas kernel (grid-less: one straight-line invocation, whole batch fused)
# ---------------------------------------------------------------------------
def torgb_kernel(mod_ref,   # (1, B*CIN)        VMEM  style-modulation row
                 wbd_ref,   # (B*COUT, B*CIN)   VMEM  block-diagonal base conv weight
                 x_ref,     # (B*CIN, HW)       VMEM  lane-dense activations
                 add_ref,   # (B*COUT, HW) skip+bias slab  OR  (B*COUT, 1) bias column
                 out_ref):  # (B*COUT, HW)      VMEM
    """out = (W_blockdiag * mod_row) @ x + add   -- one MXU matmul + VPU epilogue."""
    w = wbd_ref[...] * mod_ref[...]                          # VPU modulate (no demod)
    out_ref[...] = (jnp.dot(w, x_ref[...],                   # one MXU matmul
                            preferred_element_type=jnp.float32)
                    + add_ref[...])                          # VPU epilogue add


# ---------------------------------------------------------------------------
# One-time (per-parameter) prep, hoisted out of the per-call hot path
# ---------------------------------------------------------------------------
def prepare_torgb_params(w_mod_T, b_mod, w_conv, bias, batch_size):
    cout, cin = w_conv.shape
    w_bd = jnp.kron(jnp.eye(batch_size, dtype=jnp.float32),
                    w_conv.astype(jnp.float32))                      # (B*COUT, B*CIN)
    bias_col = jnp.tile(bias.reshape(cout, 1).astype(jnp.float32),
                        (batch_size, 1))                              # (B*COUT, 1)
    return dict(w_mod_T=jnp.asarray(w_mod_T, jnp.float32),
                b_mod=jnp.asarray(b_mod, jnp.float32).reshape(1, cin),
                w_bd=w_bd, bias_col=bias_col, cout=cout)


# ---------------------------------------------------------------------------
# Forward wrapper
# ---------------------------------------------------------------------------
def to_rgb_clean(x, style, params, skip=None):
    """ToRGBClean forward.  x:(B,CIN,H,W) NCHW, style:(B,S) -> (B,3,H,W)."""
    b, cin, h, w = x.shape
    hw = h * w
    cout = params["cout"]

    # hoisted to XLA: tiny style-modulation Linear + static layout prep
    mod = style.astype(jnp.float32) @ params["w_mod_T"] + params["b_mod"]   # (B, CIN)
    mod_row = mod.reshape(1, b * cin)                                       # (1, B*CIN)
    x_stack = x.reshape(b * cin, hw).astype(jnp.float32)                    # (B*CIN, HW)

    if skip is not None:
        # TODO(synk): jax.image.resize(method="bilinear") matches the in-file JAX
        # reference; border behavior may differ marginally from torch
        # F.interpolate(scale_factor=2, mode='bilinear', align_corners=False).
        skip_up = jax.image.resize(skip.astype(jnp.float32), (b, cout, h, w),
                                   method="bilinear")
        # bias folded into the skip slab (fuses into the resize epilogue in XLA)
        add_slab = skip_up.reshape(b * cout, hw) + params["bias_col"]       # (B*COUT, HW)
    else:
        add_slab = params["bias_col"]                                       # (B*COUT, 1)

    in_specs = [pl.BlockSpec(memory_space=pltpu.MemorySpace.VMEM) for _ in range(4)]
    out_flat = pl.pallas_call(
        torgb_kernel,
        out_shape=jax.ShapeDtypeStruct((b * cout, hw), jnp.float32),
        in_specs=in_specs,
        out_specs=pl.BlockSpec(memory_space=pltpu.MemorySpace.VMEM),
    )(mod_row, params["w_bd"], x_stack, add_slab)
    return out_flat.reshape(b, cout, h, w)


# ---------------------------------------------------------------------------
# Pure-JAX reference (mirrors the PyTorch ToRGBClean forward exactly)
# ---------------------------------------------------------------------------
def reference(x, style, w_mod_T, b_mod, w_conv, bias, skip=None):
    mod = style @ w_mod_T + b_mod                          # modulation Linear (B, CIN)
    weight = w_conv[None, :, :] * mod[:, None, :]          # (B, COUT, CIN), no demod
    out = jnp.einsum("boi,bihw->bohw", weight, x,
                     precision=jax.lax.Precision.HIGHEST)  # grouped 1x1 conv
    out = out + bias.reshape(1, COUT, 1, 1)
    if skip is not None:
        skip_up = jax.image.resize(
            skip, (x.shape[0], COUT, x.shape[2], x.shape[3]), method="bilinear")
        out = out + skip_up
    return out


# ---------------------------------------------------------------------------
if __name__ == "__main__":
    key = jax.random.PRNGKey(0)
    kx, ks, kw1, kw2, kb, kskip = jax.random.split(key, 6)

    # inputs
    x = jax.random.normal(kx, (B, CIN, H, W), jnp.float32)
    style = jax.random.normal(ks, (B, S), jnp.float32)
    skip = jax.random.normal(kskip, (B, COUT, H // 2, W // 2), jnp.float32)

    # parameters (shapes / init per the module __init__)
    # modulation Linear: kaiming_normal fan_in 'linear' -> std = 1/sqrt(S); bias = 1.0
    w_mod_T = jax.random.normal(kw1, (S, CIN), jnp.float32) / math.sqrt(S)
    b_mod = jnp.ones((1, CIN), jnp.float32)
    # conv weight: randn(1, 3, CIN, 1, 1) / sqrt(CIN * 1^2), squeezed to (3, CIN)
    w_conv = jax.random.normal(kw2, (COUT, CIN), jnp.float32) / math.sqrt(CIN)
    # ToRGBClean.bias is zero-init in torch; use small nonzero values so the path
    # is actually exercised.
    bias = 0.05 * jax.random.normal(kb, (1, COUT, 1, 1), jnp.float32)

    params = prepare_torgb_params(w_mod_T, b_mod, w_conv, bias, B)

    ref_skip = jax.block_until_ready(
        reference(x, style, w_mod_T, b_mod, w_conv, bias, skip))
    ref_noskip = jax.block_until_ready(
        reference(x, style, w_mod_T, b_mod, w_conv, bias, None))

    out_skip = jax.block_until_ready(to_rgb_clean(x, style, params, skip))
    np.testing.assert_allclose(np.asarray(out_skip), np.asarray(ref_skip),
                               rtol=2e-3, atol=2e-3)

    out_noskip = jax.block_until_ready(to_rgb_clean(x, style, params, None))
    np.testing.assert_allclose(np.asarray(out_noskip), np.asarray(ref_noskip),
                               rtol=2e-3, atol=2e-3)

    print("KERNEL_OK")
</pallas_src>

<mosaic_0001>
module attributes {stable_mosaic.version = 11 : i64} {
  func.func @torgb_kernel(%arg0: memref<1x16xf32, #tpu.memory_space<vmem>>, %arg1: memref<6x16xf32, #tpu.memory_space<vmem>>, %arg2: memref<16x256xf32, #tpu.memory_space<vmem>>, %arg3: memref<6x256xf32, #tpu.memory_space<vmem>>, %arg4: memref<6x256xf32, #tpu.memory_space<vmem>>) attributes {dimension_semantics = [], scalar_prefetch = 0 : i64, scratch_operands = 0 : i64, tpu.core_type = #tpu.core_type<tc>} {
    %c0 = arith.constant 0 : index
    %c0_0 = arith.constant 0 : index
    %0 = vector.load %arg1[%c0, %c0_0] : memref<6x16xf32, #tpu.memory_space<vmem>>, vector<6x16xf32>
    %c0_1 = arith.constant 0 : index
    %c0_2 = arith.constant 0 : index
    %1 = vector.load %arg0[%c0_1, %c0_2] : memref<1x16xf32, #tpu.memory_space<vmem>>, vector<1x16xf32>
    %2 = vector.broadcast %1 : vector<1x16xf32> to vector<6x16xf32>
    %3 = arith.mulf %0, %2 : vector<6x16xf32>
    %c0_3 = arith.constant 0 : index
    %c0_4 = arith.constant 0 : index
    %4 = vector.load %arg2[%c0_3, %c0_4] : memref<16x256xf32, #tpu.memory_space<vmem>>, vector<16x256xf32>
    %cst = arith.constant dense<0.000000e+00> : vector<6x256xf32>
    %5 = tpu.matmul %3, %4, %cst {dimension_numbers = #tpu.dot_dimension_numbers<[1], [0], [0], [1], [0, 0, 1, 1], [], []>} : vector<6x16xf32>, vector<16x256xf32>, vector<6x256xf32> -> vector<6x256xf32>
    %c0_5 = arith.constant 0 : index
    %c0_6 = arith.constant 0 : index
    %6 = vector.load %arg3[%c0_5, %c0_6] : memref<6x256xf32, #tpu.memory_space<vmem>>, vector<6x256xf32>
    %7 = arith.addf %5, %6 : vector<6x256xf32>
    %c0_7 = arith.constant 0 : index
    %c0_8 = arith.constant 0 : index
    %8 = vector.load %arg4[%c0_7, %c0_8] : memref<6x256xf32, #tpu.memory_space<vmem>>, vector<6x256xf32>
    tpu.vector_store %arg4[%c0_7, %c0_8], %7 {strides = array<i32>} : memref<6x256xf32, #tpu.memory_space<vmem>>, vector<6x256xf32>,
    return
  }
}

</mosaic_0001>

<bundles_post_ra>
// kernel: tpu_custom_call.1
= control target key start
LH: loop header
LB: loop body
LE: loop exit
PB: predicated region body
PF: predicated region fallthrough
CT: control target
= control target key end

     0   :  { %9 = vsyncpa [#allocation3], 0  ;;  %s337_s0 = inlined_call_operand.hbm [shape: f32[1,16], index: 0, kind: input, shape index: {}]   ;;  %s338_s1 = inlined_call_operand.hbm [shape: f32[6,16], index: 1, kind: input, shape index: {}]   ;;  %s339_s2 = inlined_call_operand.hbm [shape: f32[16,256], index: 2, kind: input, shape index: {}]   ;;  %s340_s3 = inlined_call_operand.hbm [shape: f32[6,256], index: 3, kind: input, shape index: {}]   ;;  %s341_s4 = inlined_call_operand.hbm [shape: f32[6,256], index: 4, kind: output, shape index: {}]  }
   0x1   :  { %10 = vsyncpa [#allocation6], 0 }
   0x2   :  { %11 = vsyncpa [#allocation9], 0  ;;  %s29_s17 = sshll.u32 %s338_s1, 4  ;;  %s30_s17 = int_to_ptr.hbm [resolvable:$true] %s29_s17 }
   0x3   :  { %12 = vsyncpa [#allocation4], 0  ;;  %s290_s18 = smov [#allocation5]   ;;  %s18_s22 = sshll.u32 %s337_s0, 4  ;;  %s19_s22 = int_to_ptr.hbm [resolvable:$true] %s18_s22 }
   0x4   :  { %s31_s19 = sshll.u32 %s290_s18, 4  ;;  %s291_s23 = smov [#allocation2]   ;;  %s32_s19 = int_to_ptr.vmem [resolvable:$true] %s31_s19 }
   0x5   :  { %34 = dma.hbm_to_vmem [thread:$0]  %s30_s17, 128, %s32_s19, [#allocation6]  }
   0x6   :  { %s20_s24 = sshll.u32 %s291_s23, 4  ;;  %s39_s27 = sshll.u32 %s339_s2, 4  ;;  %s21_s24 = int_to_ptr.vmem [resolvable:$true] %s20_s24  ;;  %s40_s27 = int_to_ptr.hbm [resolvable:$true] %s39_s27 }
   0x7   :  { %23 = dma.hbm_to_vmem [thread:$0]  %s19_s22, 16, %s21_s24, [#allocation3]  }
   0x8   :  { %s292_s1 = smov [#allocation7]   ;;  %s53_s5 = sshll.u32 %s340_s3, 4  ;;  %s54_s5 = int_to_ptr.hbm [resolvable:$true] %s53_s5 }
   0x9   :  { %s41_s28 = sshll.u32 %s292_s1, 4  ;;  %s293_s6 = smov 256   ;;  %s42_s28 = int_to_ptr.vmem [resolvable:$true] %s41_s28 }
   0xa   :  { %s294_s0 = smov 16   ;;  %s295_s7 = smov [#allocation8]  }
   0xb   :  { %47 = dma.hbm_to_vmem [thread:$0]  %s40_s27, 512, %s42_s28, [#allocation6], %s293_s6, %s293_s6, %s294_s0  }
   0xc   :  { %s55_s8 = sshll.u32 %s295_s7, 4  ;;  %s56_s8 = int_to_ptr.vmem [resolvable:$true] %s55_s8 }
   0xd   :  { %58 = dma.hbm_to_vmem [thread:$0]  %s54_s5, 256, %s56_s8, [#allocation9]  }
   0xe   :  { %282 = dma.done.wait [#allocation3], 16  }
   0xf   :  { %283 = vsyncadd [#allocation3], 4294967280 }
  0x10   :  { %284 = dma.done.wait [#allocation6], 640  }
  0x11   :  { %285 = vsyncadd [#allocation6], 4294966656 }
  0x12   :  { %286 = dma.done.wait [#allocation9], 256  }
  0x13   :  { %287 = vsyncadd [#allocation9], 4294967040  ;;  %v83_v0 = vld [vmem:[#allocation7 + $0x10] sm:$0xff]  ;;  %v84_v1 = vld [vmem:[#allocation7 + $0x18] sm:$0xff]  ;;  %vm87_vm0 = vcmask 130048   ;;  %s296_s2 = smov [#allocation10]  }
  0x14   :  { %v81_v2 = vld [vmem:[#allocation7] sm:$0xff]  ;;  %105 = vmatpush.msra.mxu0 %v83_v0  ;;  %125 = vmatpush.msra.mxu1 %v84_v1  ;;  %v82_v3 = vld [vmem:[#allocation7 + $0x8] sm:$0xff]  ;;  %v75_v4 = vld [vmem:[#allocation5] sm:$0x3f]  ;;  %s138_s3 = sshll.u32 %s296_s2, 4  ;;  %s140_s11 = sshll.u32 %s341_s4, 4  ;;  %s139_s3 = int_to_ptr.vmem [resolvable:$true] %s138_s3  ;;  %s141_s11 = int_to_ptr.hbm [resolvable:$true] %s140_s11 }
  0x15   :  { %v161_v5 = vld [vmem:[#allocation2] ss:$0 sm:$0xff]  ;;  %v85_v7 = vld [vmem:[#allocation8] sm:$0x3f]  ;;  %v86_v8 = vld [vmem:[#allocation8 + $0x8] sm:$0x3f] }
  0x16   :  { %106 = vmatpush.msra.mxu0 %v81_v2  ;;  %126 = vmatpush.msra.mxu1 %v82_v3  ;;  %v80_v6 = vmul.f32 %v161_v5, %v75_v4 }
  0x18   :  { %152 = vmatmul.msk.f32.vlgmr.msra.gmra.mxu0 %vm87_vm0, %v80_v6  ;;  %153 = vmatmul.msk.f32.vlgmr.msra.gmra.mxu1 %vm87_vm0, %v80_v6 }
  0x95   :  { %v108_v9 = vpop.f32.mrf.mxu0  ;;  %v128_v10 = vpop.f32.mrf.mxu1 }
  0x96   :  { %v109_v11 = vadd.f32 %v108_v9, %v85_v7  ;;  %v129_v12 = vadd.f32 %v128_v10, %v86_v8 }
  0x98   :  { %131 = vst [vmem:[#allocation10] sm:$0x3f] %v109_v11 }
  0x99   :  { %132 = vst [vmem:[#allocation10 + $0x8] sm:$0x3f] %v129_v12 }
  0x9a   :  { %143 = dma.vmem_to_hbm [thread:$0]  %s139_s3, 256, %s141_s11, [#allocation4]  }
  0x9b   :  { %288 = dma.done.wait [#allocation4], 256  }
  0x9c   :  { %289 = vsyncadd [#allocation4], 4294967040 }
  0x9d   :  { %148 = vsyncpa [#allocation3], 1 }
  0x9e   :  { %149 = vsyncpa [#allocation6], 1 }
  0x9f   :  { %150 = vsyncpa [#allocation9], 1 }
  0xa0   :  { %151 = vsyncpa [#allocation4], 1 }

</bundles_post_ra>
